<compile_context>
chip_gen: v6e
topology: v6e:2x2x1
jax: 0.10.0
libtpu: 0.0.40
codegen_flags: <defaults>
</compile_context>

<pallas_src>
import math

import jax
import jax.numpy as jnp
import numpy as np
from jax import lax
from jax.experimental import pallas as pl
from jax.experimental.pallas import tpu as pltpu


def _round_up(x, m):
    return ((x + m - 1) // m) * m


def _tpu_vmem_capacity_bytes():
    """Per-TensorCore VMEM capacity; conservative fallback if unavailable."""
    try:
        return int(pltpu.get_tpu_info().vmem_capacity_bytes)
    except Exception:
        return 64 << 20  # assume the smallest (v7x-class) VMEM


def _make_kernel(n, d, tile_n, tile_d, d_tiles, needs_row_mask, needs_col_mask):
    """Kernel over grid (row_blocks, d_blocks); writes one partial per row block."""

    def kernel(e_ref, p_ref, o_ref, se_acc, sp_acc, term_acc):
        i = pl.program_id(0)  # row block ("parallel")
        j = pl.program_id(1)  # D block   ("arbitrary", reduction)

        @pl.when(j == 0)
        def _():
            se_acc[...] = jnp.zeros_like(se_acc)
            sp_acc[...] = jnp.zeros_like(sp_acc)
            term_acc[...] = jnp.zeros_like(term_acc)

        e = e_ref[...].astype(jnp.float32)
        p = p_ref[...].astype(jnp.float32)

        # Mask the ragged tails of trailing (partial) blocks instead of padding
        # the tensors in HBM.  Masked lanes are forced to 0 so they drop out of
        # every sum; select() discards any garbage (even NaN) in OOB lanes.
        mask = None
        if needs_row_mask:
            row_ids = lax.broadcasted_iota(jnp.int32, (tile_n, tile_d), 0) + i * tile_n
            mask = row_ids < n
        if needs_col_mask:
            col_ids = lax.broadcasted_iota(jnp.int32, (tile_n, tile_d), 1) + j * tile_d
            col_mask = col_ids < d
            mask = col_mask if mask is None else jnp.logical_and(mask, col_mask)
        if mask is not None:
            e = jnp.where(mask, e, 0.0)
            p = jnp.where(mask, p, 0.0)

        # Per-row partial sums over this D chunk.
        se_acc[...] += jnp.sum(e, axis=1, keepdims=True)
        sp_acc[...] += jnp.sum(p, axis=1, keepdims=True)
        # xlogy convention: lanes with e == 0 (incl. masked padding) contribute 0.
        # NOTE(v7x): e/p + log is the 2-EUP/element floor; keep the exact divide
        # to stay well inside the 1e-4 tolerance.
        ratio = jnp.where(e > 0.0, e / p, 1.0)
        term_acc[...] += jnp.sum(e * jnp.log(ratio), axis=1, keepdims=True)

        @pl.when(j == d_tiles - 1)
        def _():
            # Per-row KL of the sum-normalized rows:
            #   sum_d e_n*log(e_n/p_n) = (1/Se)*sum_d e*log(e/p) + log(Sp/Se)
            inv_se = pl.reciprocal(se_acc[...])  # exact; approx risks the rtol
            kl = term_acc[...] * inv_se + jnp.log(sp_acc[...] * inv_se)
            if needs_row_mask:
                rows = lax.broadcasted_iota(jnp.int32, (tile_n, 1), 0) + i * tile_n
                kl = jnp.where(rows < n, kl, 0.0)  # out-of-range rows -> 0
            o_ref[0, 0] = jnp.sum(kl)

    return kernel


def loss_frame(expected, predicted, *, tile_n=None, tile_d=None):
    """Equivalent of LossFrame.forward(expected, predicted)."""
    assert expected.shape == predicted.shape and expected.ndim >= 3
    n = int(expected.shape[0]) * int(expected.shape[1])   # batchmean divisor
    d = int(math.prod(expected.shape[2:]))
    assert n >= 1 and d >= 1

    # Metadata-only reshape: no HBM copy.
    e2 = expected.reshape(n, d)
    p2 = predicted.reshape(n, d)
    itemsize = jnp.dtype(e2.dtype).itemsize

    # Per-generation tile / VMEM budgets.
    vmem_cap = _tpu_vmem_capacity_bytes()
    if vmem_cap <= (64 << 20):        # v7x-class: 64 MiB VMEM per TensorCore
        tile_target = 3 << 20         # per-input-tile bytes
        vmem_limit = 44 << 20
    else:                             # v5e / v6e: 128 MiB VMEM
        tile_target = 8 << 20
        vmem_limit = 100 << 20

    if tile_d is None:
        # Lane tile (multiple of 128), capped so that >= 8 rows fit the target.
        max_tile_d = max(128, (tile_target // (8 * itemsize)) // 128 * 128)
        tile_d = min(_round_up(d, 128), max_tile_d)
    else:
        tile_d = max(128, _round_up(int(tile_d), 128))
    if tile_n is None:
        # Row tile (multiple of 8), filling the target with rows of tile_d.
        tile_n = max(8, (tile_target // (tile_d * itemsize)) // 8 * 8)
        tile_n = min(tile_n, _round_up(n, 8))
    else:
        tile_n = max(8, _round_up(int(tile_n), 8))

    nb = pl.cdiv(n, tile_n)          # row blocks (leading, "parallel")
    d_tiles = pl.cdiv(d, tile_d)     # D blocks   (trailing, "arbitrary")

    needs_row_mask = (nb * tile_n) != n
    needs_col_mask = (d_tiles * tile_d) != d

    kernel = _make_kernel(n, d, tile_n, tile_d, d_tiles,
                          needs_row_mask, needs_col_mask)

    in_spec = pl.BlockSpec((tile_n, tile_d), lambda i, j: (i, j))

    partials = pl.pallas_call(
        kernel,
        out_shape=jax.ShapeDtypeStruct((nb, 1), jnp.float32),
        grid_spec=pltpu.PrefetchScalarGridSpec(
            num_scalar_prefetch=0,
            grid=(nb, d_tiles),
            in_specs=[in_spec, in_spec],
            out_specs=pl.BlockSpec((1, 1), lambda i, j: (i, 0),
                                   memory_space=pltpu.MemorySpace.SMEM),
            scratch_shapes=[pltpu.VMEM((tile_n, 1), jnp.float32)] * 3,
        ),
        compiler_params=pltpu.CompilerParams(
            dimension_semantics=("parallel", "arbitrary"),
            vmem_limit_bytes=int(vmem_limit),
        ),
        cost_estimate=pl.CostEstimate(
            flops=10 * n * d,
            transcendentals=2 * n * d,
            bytes_accessed=2 * n * d * itemsize + 4 * nb,
        ),
    )(e2, p2)

    # KLDivLoss(reduction='batchmean'): global sum divided by N = B*T.
    return jnp.sum(partials) * (1.0 / n)


if __name__ == "__main__":
    key = jax.random.PRNGKey(0)

    def reference(expected, predicted):
        e = np.asarray(expected, dtype=np.float64)
        p = np.asarray(predicted, dtype=np.float64)
        n = e.shape[0] * e.shape[1]
        e2 = e.reshape(n, -1)
        p2 = p.reshape(n, -1)
        e_n = e2 / e2.sum(axis=1, keepdims=True)
        p_log = np.log(p2 / p2.sum(axis=1, keepdims=True))
        return float(np.sum(e_n * (np.log(e_n) - p_log)) / n)

    cases = [
        # (shape, forced tile_n, forced tile_d)
        ((2, 2, 4, 16, 16), None, None),   # D=1024 lane-aligned, N=4 (row mask)
        ((2, 3, 3, 15, 15), None, None),   # D=675 ragged lanes, N=6 (row+col mask)
        ((2, 4, 4, 18, 18), 8, 256),       # multi D-tile accumulation + col mask
        ((3, 4, 3, 16, 16), 8, 128),       # multiple row blocks + row mask
    ]
    for shape, tn, td in cases:
        key, k1, k2 = jax.random.split(key, 3)
        expected = jax.random.uniform(k1, shape, jnp.float32, minval=0.1, maxval=1.0)
        predicted = jax.random.uniform(k2, shape, jnp.float32, minval=0.1, maxval=1.0)

        loss = jax.block_until_ready(loss_frame(expected, predicted,
                                                tile_n=tn, tile_d=td))
        ref = reference(expected, predicted)
        assert np.isfinite(float(loss)), (float(loss), shape)
        assert abs(float(loss) - ref) <= 1e-4 * abs(ref) + 1e-6, (float(loss), ref, shape)

    print("KERNEL_OK")
</pallas_src>

<mosaic_0001>
module attributes {stable_mosaic.version = 11 : i64} {
  func.func @kernel(%arg0: i32, %arg1: i32, %arg2: memref<8x1024xf32, #tpu.memory_space<vmem>>, %arg3: memref<8x1024xf32, #tpu.memory_space<vmem>>, %arg4: memref<1x1xf32, #tpu.memory_space<smem>>, %arg5: memref<8x1xf32, #tpu.memory_space<vmem>>, %arg6: memref<8x1xf32, #tpu.memory_space<vmem>>, %arg7: memref<8x1xf32, #tpu.memory_space<vmem>>) attributes {dimension_semantics = [#tpu.dimension_semantics<parallel>, #tpu.dimension_semantics<arbitrary>], iteration_bounds = array<i64: 1, 1>, scalar_prefetch = 0 : i64, scratch_operands = 3 : i64, tpu.core_type = #tpu.core_type<tc>, window_params = [{transform_indices = @transform_0, window_bounds = array<i64: 8, 1024>}, {transform_indices = @transform_1, window_bounds = array<i64: 8, 1024>}, {transform_indices = @transform_2, window_bounds = array<i64: 1, 1>}]} {
    %c0_i32 = arith.constant 0 : i32
    %0 = arith.cmpi eq, %arg1, %c0_i32 : i32
    %1 = arith.extui %0 : i1 to i32
    %c0_i32_0 = arith.constant 0 : i32
    %2 = arith.cmpi ne, %1, %c0_i32_0 : i32
    scf.if %2 {
      %cst_24 = arith.constant 0.000000e+00 : f32
      %40 = vector.broadcast %cst_24 : f32 to vector<8x1xf32>
      %c0_25 = arith.constant 0 : index
      %c0_26 = arith.constant 0 : index
      %41 = vector.load %arg5[%c0_25, %c0_26] : memref<8x1xf32, #tpu.memory_space<vmem>>, vector<8x1xf32>
      tpu.vector_store %arg5[%c0_25, %c0_26], %40 {strides = array<i32>} : memref<8x1xf32, #tpu.memory_space<vmem>>, vector<8x1xf32>,
      %cst_27 = arith.constant 0.000000e+00 : f32
      %42 = vector.broadcast %cst_27 : f32 to vector<8x1xf32>
      %c0_28 = arith.constant 0 : index
      %c0_29 = arith.constant 0 : index
      %43 = vector.load %arg6[%c0_28, %c0_29] : memref<8x1xf32, #tpu.memory_space<vmem>>, vector<8x1xf32>
      tpu.vector_store %arg6[%c0_28, %c0_29], %42 {strides = array<i32>} : memref<8x1xf32, #tpu.memory_space<vmem>>, vector<8x1xf32>,
      %cst_30 = arith.constant 0.000000e+00 : f32
      %44 = vector.broadcast %cst_30 : f32 to vector<8x1xf32>
      %c0_31 = arith.constant 0 : index
      %c0_32 = arith.constant 0 : index
      %45 = vector.load %arg7[%c0_31, %c0_32] : memref<8x1xf32, #tpu.memory_space<vmem>>, vector<8x1xf32>
      tpu.vector_store %arg7[%c0_31, %c0_32], %44 {strides = array<i32>} : memref<8x1xf32, #tpu.memory_space<vmem>>, vector<8x1xf32>,
    } else {
    }
    %c0 = arith.constant 0 : index
    %c0_1 = arith.constant 0 : index
    %3 = vector.load %arg2[%c0, %c0_1] : memref<8x1024xf32, #tpu.memory_space<vmem>>, vector<8x1024xf32>
    %c0_2 = arith.constant 0 : index
    %c0_3 = arith.constant 0 : index
    %4 = vector.load %arg3[%c0_2, %c0_3] : memref<8x1024xf32, #tpu.memory_space<vmem>>, vector<8x1024xf32>
    %5 = tpu.iota {dimensions = array<i32: 0>} : vector<8x1024xi32>
    %c8_i32 = arith.constant 8 : i32
    %6 = arith.muli %arg0, %c8_i32 : i32
    %7 = vector.broadcast %6 : i32 to vector<8x1024xi32>
    %8 = arith.addi %5, %7 : vector<8x1024xi32>
    %c4_i32 = arith.constant 4 : i32
    %9 = vector.broadcast %c4_i32 : i32 to vector<8x1024xi32>
    %10 = arith.cmpi slt, %8, %9 : vector<8x1024xi32>
    %cst = arith.constant 0.000000e+00 : f32
    %11 = vector.broadcast %cst : f32 to vector<8x1024xf32>
    %12 = arith.select %10, %3, %11 : vector<8x1024xi1>, vector<8x1024xf32>
    %cst_4 = arith.constant 0.000000e+00 : f32
    %13 = vector.broadcast %cst_4 : f32 to vector<8x1024xf32>
    %14 = arith.select %10, %4, %13 : vector<8x1024xi1>, vector<8x1024xf32>
    %c0_5 = arith.constant 0 : index
    %c0_6 = arith.constant 0 : index
    %15 = vector.load %arg5[%c0_5, %c0_6] : memref<8x1xf32, #tpu.memory_space<vmem>>, vector<8x1xf32>
    %cst_7 = arith.constant dense<0.000000e+00> : vector<8xf32>
    %16 = vector.multi_reduction <add>, %12, %cst_7 [1] : vector<8x1024xf32> to vector<8xf32>
    %17 = vector.shape_cast %16 : vector<8xf32> to vector<8x1xf32>
    %18 = arith.addf %15, %17 : vector<8x1xf32>
    %c0_8 = arith.constant 0 : index
    %c0_9 = arith.constant 0 : index
    %19 = vector.load %arg5[%c0_8, %c0_9] : memref<8x1xf32, #tpu.memory_space<vmem>>, vector<8x1xf32>
    tpu.vector_store %arg5[%c0_8, %c0_9], %18 {strides = array<i32>} : memref<8x1xf32, #tpu.memory_space<vmem>>, vector<8x1xf32>,
    %c0_10 = arith.constant 0 : index
    %c0_11 = arith.constant 0 : index
    %20 = vector.load %arg6[%c0_10, %c0_11] : memref<8x1xf32, #tpu.memory_space<vmem>>, vector<8x1xf32>
    %cst_12 = arith.constant dense<0.000000e+00> : vector<8xf32>
    %21 = vector.multi_reduction <add>, %14, %cst_12 [1] : vector<8x1024xf32> to vector<8xf32>
    %22 = vector.shape_cast %21 : vector<8xf32> to vector<8x1xf32>
    %23 = arith.addf %20, %22 : vector<8x1xf32>
    %c0_13 = arith.constant 0 : index
    %c0_14 = arith.constant 0 : index
    %24 = vector.load %arg6[%c0_13, %c0_14] : memref<8x1xf32, #tpu.memory_space<vmem>>, vector<8x1xf32>
    tpu.vector_store %arg6[%c0_13, %c0_14], %23 {strides = array<i32>} : memref<8x1xf32, #tpu.memory_space<vmem>>, vector<8x1xf32>,
    %cst_15 = arith.constant 0.000000e+00 : f32
    %25 = vector.broadcast %cst_15 : f32 to vector<8x1024xf32>
    %26 = arith.cmpf ogt, %12, %25 : vector<8x1024xf32>
    %27 = arith.divf %12, %14 : vector<8x1024xf32>
    %cst_16 = arith.constant 1.000000e+00 : f32
    %28 = vector.broadcast %cst_16 : f32 to vector<8x1024xf32>
    %29 = arith.select %26, %27, %28 : vector<8x1024xi1>, vector<8x1024xf32>
    %c0_17 = arith.constant 0 : index
    %c0_18 = arith.constant 0 : index
    %30 = vector.load %arg7[%c0_17, %c0_18] : memref<8x1xf32, #tpu.memory_space<vmem>>, vector<8x1xf32>
    %31 = math.log %29 : vector<8x1024xf32>
    %32 = arith.mulf %12, %31 : vector<8x1024xf32>
    %cst_19 = arith.constant dense<0.000000e+00> : vector<8xf32>
    %33 = vector.multi_reduction <add>, %32, %cst_19 [1] : vector<8x1024xf32> to vector<8xf32>
    %34 = vector.shape_cast %33 : vector<8xf32> to vector<8x1xf32>
    %35 = arith.addf %30, %34 : vector<8x1xf32>
    %c0_20 = arith.constant 0 : index
    %c0_21 = arith.constant 0 : index
    %36 = vector.load %arg7[%c0_20, %c0_21] : memref<8x1xf32, #tpu.memory_space<vmem>>, vector<8x1xf32>
    tpu.vector_store %arg7[%c0_20, %c0_21], %35 {strides = array<i32>} : memref<8x1xf32, #tpu.memory_space<vmem>>, vector<8x1xf32>,
    %c0_i32_22 = arith.constant 0 : i32
    %37 = arith.cmpi eq, %arg1, %c0_i32_22 : i32
    %38 = arith.extui %37 : i1 to i32
    %c0_i32_23 = arith.constant 0 : i32
    %39 = arith.cmpi ne, %38, %c0_i32_23 : i32
    scf.if %39 {
      %c0_24 = arith.constant 0 : index
      %c0_25 = arith.constant 0 : index
      %40 = vector.load %arg5[%c0_24, %c0_25] : memref<8x1xf32, #tpu.memory_space<vmem>>, vector<8x1xf32>
      %41 = tpu.reciprocal %40 : vector<8x1xf32> -> vector<8x1xf32>
      %c0_26 = arith.constant 0 : index
      %c0_27 = arith.constant 0 : index
      %42 = vector.load %arg7[%c0_26, %c0_27] : memref<8x1xf32, #tpu.memory_space<vmem>>, vector<8x1xf32>
      %43 = arith.mulf %42, %41 : vector<8x1xf32>
      %c0_28 = arith.constant 0 : index
      %c0_29 = arith.constant 0 : index
      %44 = vector.load %arg6[%c0_28, %c0_29] : memref<8x1xf32, #tpu.memory_space<vmem>>, vector<8x1xf32>
      %45 = arith.mulf %44, %41 : vector<8x1xf32>
      %46 = math.log %45 : vector<8x1xf32>
      %47 = arith.addf %43, %46 : vector<8x1xf32>
      %48 = tpu.iota {dimensions = array<i32: 0>} : vector<8x1xi32>
      %c8_i32_30 = arith.constant 8 : i32
      %49 = arith.muli %arg0, %c8_i32_30 : i32
      %50 = vector.broadcast %49 : i32 to vector<8x1xi32>
      %51 = arith.addi %48, %50 : vector<8x1xi32>
      %c4_i32_31 = arith.constant 4 : i32
      %52 = vector.broadcast %c4_i32_31 : i32 to vector<8x1xi32>
      %53 = arith.cmpi slt, %51, %52 : vector<8x1xi32>
      %cst_32 = arith.constant 0.000000e+00 : f32
      %54 = vector.broadcast %cst_32 : f32 to vector<8x1xf32>
      %55 = arith.select %53, %47, %54 : vector<8x1xi1>, vector<8x1xf32>
      %56 = vector.shape_cast %55 : vector<8x1xf32> to vector<1x8x1xf32>
      %cst_33 = arith.constant dense<0.000000e+00> : vector<1xf32>
      %57 = vector.multi_reduction <add>, %56, %cst_33 [1, 2] : vector<1x8x1xf32> to vector<1xf32>
      %58 = vector.shape_cast %57 : vector<1xf32> to vector<1x1x1xf32>
      %59 = vector.extract %58[0, 0, 0] : f32 from vector<1x1x1xf32>
      %c0_34 = arith.constant 0 : index
      %c0_35 = arith.constant 0 : index
      %60 = memref.load %arg4[%c0_34, %c0_35] : memref<1x1xf32, #tpu.memory_space<smem>>
      memref.store %59, %arg4[%c0_34, %c0_35] : memref<1x1xf32, #tpu.memory_space<smem>>
    } else {
    }
    return
  }
  func.func @transform_0(%arg0: i32, %arg1: i32) -> (i32, i32) {
    %c0_i32 = arith.constant 0 : i32
    return %arg0, %arg1 : i32, i32
  }
  func.func @transform_1(%arg0: i32, %arg1: i32) -> (i32, i32) {
    %c0_i32 = arith.constant 0 : i32
    return %arg0, %arg1 : i32, i32
  }
  func.func @transform_2(%arg0: i32, %arg1: i32) -> (i32, i32) {
    %c0_i32 = arith.constant 0 : i32
    %c0_i32_0 = arith.constant 0 : i32
    return %arg0, %c0_i32 : i32, i32
  }
}

</mosaic_0001>

<bundles_post_ra>
// kernel: tpu_custom_call.1
= control target key start
LH: loop header
LB: loop body
LE: loop exit
PB: predicated region body
PF: predicated region fallthrough
CT: control target
= control target key end

     0   :  { %7 = vsyncpa [#allocation6], 0  ;;  %s491_s0 = inlined_call_operand.hbm [shape: f32[4,1024], index: 0, kind: input, shape index: {}]   ;;  %s492_s1 = inlined_call_operand.hbm [shape: f32[4,1024], index: 1, kind: input, shape index: {}]   ;;  %s493_s2 = inlined_call_operand.hbm [shape: f32[1,1], index: 2, kind: output, shape index: {}]  }
   0x1   :  { %8 = vsyncpa [#allocation9], 0 }
   0x2   :  { %9 = vsyncpa [#allocation7], 0 }
   0x3   :  { %14 = vsyncadd [#allocation6], 512  ;;  %s365_s9 = smov [#allocation5]  }
   0x4   :  { %s15_s10 = sshll.u32 %s365_s9, 4  ;;  %s16_s10 = int_to_ptr.vmem [resolvable:$true] %s15_s10 }
   0x5   :  { %s319_s11 = scalar_lea.vmem %s16_s10, 512  ;;  %s323_s12 = scalar_lea.vmem %s16_s10, 1024 }
   0x6   :  { %p320_p0 = scmp.ne.s32.totalorder %s16_s10, %s319_s11  ;;  %p324_p1 = scmp.lt.s32.totalorder %s16_s10, %s16_s10 }
   0x7   :  { %p325_p2 = scmp.lt.s32.totalorder %s323_s12, %s319_s11 }
   0x9   :  { %p326_p3 = por %p325_p2, %p324_p1 }
   0xb   :  { %p327_p4 = pnand %p326_p3, %p320_p0 }
   0xd   :  { %330 = shalt.err (!%p327_p4)
}
   0xe   :  { %s366_s13 = smov 512   ;;  %s367_s14 = smov 32  }
   0xf   :  { %21 = dma.hbm_to_vmem [thread:$0]  %s491_s0, 512, %s16_s10, [#allocation6], %s366_s13, %s366_s13, %s367_s14  }
  0x10   :  { %26 = vsyncadd [#allocation9], 512  ;;  %s368_s17 = smov [#allocation8]  }
  0x11   :  { %s27_s18 = sshll.u32 %s368_s17, 4  ;;  %s28_s18 = int_to_ptr.vmem [resolvable:$true] %s27_s18 }
  0x12   :  { %s339_s19 = scalar_lea.vmem %s28_s18, 512  ;;  %s343_s20 = scalar_lea.vmem %s28_s18, 1024 }
  0x13   :  { %p340_p5 = scmp.ne.s32.totalorder %s28_s18, %s339_s19  ;;  %p344_p6 = scmp.lt.s32.totalorder %s28_s18, %s28_s18 }
  0x14   :  { %p345_p7 = scmp.lt.s32.totalorder %s343_s20, %s339_s19 }
  0x16   :  { %p346_p8 = por %p345_p7, %p344_p6 }
  0x18   :  { %p347_p9 = pnand %p346_p8, %p340_p5 }
  0x1a   :  { %350 = shalt.err (!%p347_p9)
}
  0x1b   :  { %33 = dma.hbm_to_vmem [thread:$0]  %s492_s1, 512, %s28_s18, [#allocation9], %s366_s13, %s366_s13, %s367_s14  }
  0x1c   :  { %359 = dma.done.wait [#allocation6], 1024  }
  0x1d   :  { %360 = vsyncadd [#allocation6], 4294966272 }
  0x1e   :  { %361 = dma.done.wait [#allocation9], 1024  }
  0x1f   :  { %362 = vsyncadd [#allocation9], 4294966272  ;;  %vm44_vm0 = vcmask 7168   ;;  %v369_v0 = vmov 0.0   ;;  %v64_v1 = vlaneseq  ;;  %v48_v3 = vld [vmem:[#allocation5] sm:$0xff]  ;;  %v49_v4 = vld [vmem:[#allocation5 + $0x8] sm:$0xff] }
  0x20   :  { %45 = vst.msk [vmem:[#allocation2] sm:$0xff] %vm44_vm0, %v369_v0  ;;  %46 = vst.msk [vmem:[#allocation3] sm:$0xff] %vm44_vm0, %v369_v0  ;;  %v52_v5 = vld [vmem:[#allocation5 + $0x20] sm:$0xff]  ;;  %v53_v6 = vld [vmem:[#allocation5 + $0x28] sm:$0xff]  ;;  %s370_s1 = smov [#allocation10]  }
  0x21   :  { %47 = vst.msk [vmem:[#allocation4] sm:$0xff] %vm44_vm0, %v369_v0  ;;  %v395_v2 = vshrl.u32 %v64_v1, 7  ;;  %v50_v7 = vld [vmem:[#allocation5 + $0x10] sm:$0xff]  ;;  %v78_v9 = vcombine.low %v48_v3, %v52_v5  ;;  %v79_v10 = vcombine.high %v48_v3, %v52_v5  ;;  %v80_v11 = vcombine.low %v49_v4, %v53_v6  ;;  %v51_v13 = vld [vmem:[#allocation5 + $0x18] sm:$0xff]  ;;  %v56_v19 = vld [vmem:[#allocation8] sm:$0xff] }
  0x22   :  { %v54_v8 = vld [vmem:[#allocation5 + $0x30] sm:$0xff]  ;;  %v81_v12 = vcombine.high %v49_v4, %v53_v6  ;;  %v55_v16 = vld [vmem:[#allocation5 + $0x38] sm:$0xff]  ;;  %v60_v20 = vld [vmem:[#allocation8 + $0x20] sm:$0xff] }
  0x23   :  { %vm69_vm1 = vcmp.lt.s32.totalorder %v395_v2, 4  ;;  %v82_v17 = vcombine.low %v50_v7, %v54_v8  ;;  %v57_v22 = vld [vmem:[#allocation8 + $0x8] sm:$0xff]  ;;  %v83_v24 = vcombine.high %v50_v7, %v54_v8  ;;  %v58_v26 = vld [vmem:[#allocation8 + $0x10] sm:$0xff]  ;;  %v84_v28 = vcombine.low %v51_v13, %v55_v16  ;;  %v59_v33 = vld [vmem:[#allocation8 + $0x18] sm:$0xff] }
  0x24   :  { %v400_v14 = vsel %vm69_vm1, %v78_v9, 0.0  ;;  %v404_v15 = vsel %vm69_vm1, %v79_v10, 0.0  ;;  %v408_v18 = vsel %vm69_vm1, %v80_v11, 0.0  ;;  %v61_v23 = vld [vmem:[#allocation8 + $0x28] sm:$0xff]  ;;  %v414_v25 = vsel %vm69_vm1, %v81_v12, 0.0  ;;  %v62_v27 = vld [vmem:[#allocation8 + $0x30] sm:$0xff] }
  0x25   :  { %v135_v21 = vadd.f32 %v404_v15, %v400_v14  ;;  %v110_v30 = vcombine.low %v56_v19, %v60_v20  ;;  %v111_v31 = vcombine.high %v56_v19, %v60_v20  ;;  %v419_v32 = vsel %vm69_vm1, %v82_v17, 0.0  ;;  %v63_v34 = vld [vmem:[#allocation8 + $0x38] sm:$0xff] }
  0x26   :  { %v112_v35 = vcombine.low %v57_v22, %v61_v23  ;;  %v113_v36 = vcombine.high %v57_v22, %v61_v23  ;;  %v114_v38 = vcombine.low %v58_v26, %v62_v27  ;;  %v85_v40 = vcombine.high %v51_v13, %v55_v16 }
  0x27   :  { %v136_v29 = vadd.f32 %v135_v21, %v408_v18  ;;  %v126_v39 = vsel %vm69_vm1, %v110_v30, 0.0  ;;  %v426_v41 = vsel %vm69_vm1, %v83_v24, 0.0  ;;  %v115_v42 = vcombine.high %v58_v26, %v62_v27 }
  0x28   :  { %v127_v43 = vsel %vm69_vm1, %v111_v31, 0.0  ;;  %v432_v44 = vsel %vm69_vm1, %v84_v28, 0.0  ;;  %v116_v46 = vcombine.low %v59_v33, %v63_v34  ;;  %v128_v47 = vsel %vm69_vm1, %v112_v35, 0.0 }
  0x29   :  { %v137_v37 = vadd.f32 %v136_v29, %v414_v25  ;;  %v117_v48 = vcombine.high %v59_v33, %v63_v34  ;;  %v129_v49 = vsel %vm69_vm1, %v113_v36, 0.0  ;;  %v148_v50 = vadd.f32 %v127_v43, %v126_v39 }
  0x2a   :  { %275 = vrcp.f32 %v126_v39  ;;  %v130_v52 = vsel %vm69_vm1, %v114_v38, 0.0  ;;  %v444_v53 = vsel %vm69_vm1, %v85_v40, 0.0  ;;  %v131_v54 = vsel %vm69_vm1, %v115_v42, 0.0 }
  0x2b   :  { %v138_v45 = vadd.f32 %v137_v37, %v419_v32  ;;  %277 = vrcp.f32 %v127_v43  ;;  %v149_v55 = vadd.f32 %v148_v50, %v128_v47  ;;  %v132_v57 = vsel %vm69_vm1, %v116_v46, 0.0 }
  0x2c   :  { %279 = vrcp.f32 %v128_v47  ;;  %v133_v58 = vsel %vm69_vm1, %v117_v48, 0.0  ;;  %vm159_vm2 = vcmp.gt.f32.partialorder %v400_v14, 0.0  ;;  %vm160_vm3 = vcmp.gt.f32.partialorder %v404_v15, 0.0 }
  0x2d   :  { %v139_v51 = vadd.f32 %v138_v45, %v426_v41  ;;  %281 = vrcp.f32 %v129_v49  ;;  %v150_v59 = vadd.f32 %v149_v55, %v129_v49  ;;  %vm161_vm4 = vcmp.gt.f32.partialorder %v408_v18, 0.0 }
  0x2e   :  { %283 = vrcp.f32 %v130_v52  ;;  %vm162_vm5 = vcmp.gt.f32.partialorder %v414_v25, 0.0  ;;  %vm163_vm6 = vcmp.gt.f32.partialorder %v419_v32, 0.0  ;;  %vm164_vm7 = vcmp.gt.f32.partialorder %v426_v41, 0.0 }
  0x2f   :  { %v140_v56 = vadd.f32 %v139_v51, %v432_v44  ;;  %285 = vrcp.f32 %v131_v54  ;;  %v151_v61 = vadd.f32 %v150_v59, %v130_v52  ;;  %vm165_vm8 = vcmp.gt.f32.partialorder %v432_v44, 0.0 }
  0x30   :  { %287 = vrcp.f32 %v132_v57  ;;  %vm166_vm9 = vcmp.gt.f32.partialorder %v444_v53, 0.0 }
  0x31   :  { %v141_v60 = vadd.f32 %v140_v56, %v444_v53  ;;  %289 = vrcp.f32 %v133_v58  ;;  %v152_v62 = vadd.f32 %v151_v61, %v131_v54 }
  0x33   :  { %142 = vadd.xlane.f32.xlu0 %v141_v60  ;;  %v153_v63 = vadd.f32 %v152_v62, %v132_v57 }
  0x35   :  { %v154_v0 = vadd.f32 %v153_v63, %v133_v58 }
  0x37   :  { %v276_v1 = vpop.eup %275  ;;  %155 = vadd.xlane.f32.xlu0 %v154_v0 }
  0x38   :  { %v278_v3 = vpop.eup %277  ;;  %v168_v4 = vmul.f32 %v276_v1, %v400_v14 }
  0x39   :  { %v280_v5 = vpop.eup %279  ;;  %v170_v6 = vmul.f32 %v278_v3, %v404_v15 }
  0x3a   :  { %v282_v7 = vpop.eup %281  ;;  %v172_v8 = vmul.f32 %v280_v5, %v408_v18  ;;  %v183_v9 = vsel %vm159_vm2, %v168_v4, 1.0 }
  0x3b   :  { %v284_v10 = vpop.eup %283  ;;  %v174_v11 = vmul.f32 %v282_v7, %v414_v25  ;;  %v184_v12 = vsel %vm160_vm3, %v170_v6, 1.0  ;;  %291 = vlog2.f32 %v183_v9 }
  0x3c   :  { %v286_v13 = vpop.eup %285  ;;  %v176_v16 = vmul.f32 %v284_v10, %v419_v32  ;;  %v185_v17 = vsel %vm161_vm4, %v172_v8, 1.0  ;;  %293 = vlog2.f32 %v184_v12 }
  0x3d   :  { %v288_v19 = vpop.eup %287  ;;  %v178_v20 = vmul.f32 %v286_v13, %v426_v41  ;;  %v186_v21 = vsel %vm162_vm5, %v174_v11, 1.0  ;;  %295 = vlog2.f32 %v185_v17 }
  0x3e   :  { %v290_v22 = vpop.eup %289  ;;  %v180_v23 = vmul.f32 %v288_v19, %v432_v44  ;;  %v187_v24 = vsel %vm163_vm6, %v176_v16, 1.0  ;;  %297 = vlog2.f32 %v186_v21 }
  0x3f   :  { %v182_v26 = vmul.f32 %v290_v22, %v444_v53  ;;  %v188_v27 = vsel %vm164_vm7, %v178_v20, 1.0  ;;  %299 = vlog2.f32 %v187_v24 }
  0x40   :  { %v189_v28 = vsel %vm165_vm8, %v180_v23, 1.0  ;;  %301 = vlog2.f32 %v188_v27 }
  0x41   :  { %v190_v29 = vsel %vm166_vm9, %v182_v26, 1.0  ;;  %303 = vlog2.f32 %v189_v28 }
  0x42   :  { %305 = vlog2.f32 %v190_v29 }
  0x48   :  { %v292_v30 = vpop.eup %291 }
  0x49   :  { %v294_v31 = vpop.eup %293  ;;  %v193_v33 = vmul.f32 0.6931472, %v292_v30 }
  0x4a   :  { %v296_v34 = vpop.eup %295  ;;  %v195_v35 = vmul.f32 0.6931472, %v294_v31 }
  0x4b   :  { %v298_v36 = vpop.eup %297  ;;  %v197_v37 = vmul.f32 0.6931472, %v296_v34  ;;  %v208_v38 = vmul.f32 %v193_v33, %v400_v14 }
  0x4c   :  { %v300_v39 = vpop.eup %299  ;;  %v199_v40 = vmul.f32 0.6931472, %v298_v36  ;;  %v209_v42 = vmul.f32 %v195_v35, %v404_v15 }
  0x4d   :  { %v302_v43 = vpop.eup %301  ;;  %v201_v45 = vmul.f32 0.6931472, %v300_v39  ;;  %v210_v46 = vmul.f32 %v197_v37, %v408_v18 }
  0x4e   :  { %v304_v47 = vpop.eup %303  ;;  %v203_v48 = vmul.f32 0.6931472, %v302_v43  ;;  %v211_v49 = vmul.f32 %v199_v40, %v414_v25  ;;  %v216_v50 = vadd.f32 %v209_v42, %v208_v38  ;;  %v134_v25 = vld [vmem:[#allocation2] sm:$0xff] }
  0x4f   :  { %v306_v51 = vpop.eup %305  ;;  %v205_v52 = vmul.f32 0.6931472, %v304_v47  ;;  %v212_v54 = vmul.f32 %v201_v45, %v419_v32  ;;  %v147_v32 = vld [vmem:[#allocation3] sm:$0xff] }
  0x50   :  { %v217_v55 = vadd.f32 %v216_v50, %v210_v46  ;;  %v207_v56 = vmul.f32 0.6931472, %v306_v51  ;;  %v213_v14 = vmul.f32 %v203_v48, %v426_v41 }
  0x51   :  { %v214_v15 = vmul.f32 %v205_v52, %v432_v44 }
  0x52   :  { %v218_v57 = vadd.f32 %v217_v55, %v211_v49  ;;  %v215_v59 = vmul.f32 %v207_v56, %v444_v53  ;;  %v191_v53 = vld [vmem:[#allocation4] sm:$0xff] }
  0x54   :  { %v219_v58 = vadd.f32 %v218_v57, %v212_v54 }
  0x56   :  { %v220_v18 = vadd.f32 %v219_v58, %v213_v14 }
  0x58   :  { %v221_v60 = vadd.f32 %v220_v18, %v214_v15 }
  0x5a   :  { %v222_v61 = vadd.f32 %v221_v60, %v215_v59 }
  0x5c   :  { %223 = vadd.xlane.f32.xlu1 %v222_v61 }
  0xbc   :  { %v143_v62 = vpop.xlane.xlu0 %142 }
  0xbd   :  { %v144_v63 = vadd.f32 %v143_v62, %v134_v25 }
  0xbf   :  { %146 = vst.msk [vmem:[#allocation2] sm:$0xff] %vm44_vm0, %v144_v63 }
  0xc0   :  { %v156_v0 = vpop.xlane.xlu0 %155 }
  0xc1   :  { %v157_v1 = vadd.f32 %v156_v0, %v147_v32 }
  0xc3   :  { %158 = vst.msk [vmem:[#allocation3] sm:$0xff] %vm44_vm0, %v157_v1 }
  0xc6   :  { %v230_v41 = vld [vmem:[#allocation2] sm:$0xff] }
  0xc7   :  { %307 = vrcp.f32 %v230_v41 }
  0xca   :  { %v234_v3 = vld [vmem:[#allocation3] sm:$0xff] }
  0xd4   :  { %v308_v44 = vpop.eup %307 }
  0xd5   :  { %v235_v4 = vmul.f32 %v308_v44, %v234_v3 }
  0xd7   :  { %309 = vlog2.f32 %v235_v4 }
  0xe4   :  { %v310_v7 = vpop.eup %309 }
  0xe5   :  { %v224_v5 = vpop.xlane.xlu1 %223  ;;  %v237_v8 = vmul.f32 0.6931472, %v310_v7 }
  0xe6   :  { %v225_v6 = vadd.f32 %v224_v5, %v191_v53 }
  0xe8   :  { %226 = vst.msk [vmem:[#allocation4] sm:$0xff] %vm44_vm0, %v225_v6 }
  0xef   :  { %v232_v9 = vld [vmem:[#allocation4] sm:$0xff] }
  0xf0   :  { %v233_v10 = vmul.f32 %v308_v44, %v232_v9 }
  0xf2   :  { %v238_v11 = vadd.f32 %v237_v8, %v233_v10 }
  0xf4   :  { %v239_v12 = vsel %vm69_vm1, %v238_v11, 0.0 }
  0xf5   :  { %v240_v13 = vsel %vm44_vm0, %v239_v12, 0.0 }
  0xf6   :  { %241 = vadd.xlane.f32.xlu1 %v240_v13 }
 0x17f   :  { %v242_v16 = vpop.xlane.xlu1 %241 }
 0x180   :  { %v243_v17 = vrot.slane %v242_v16, 4 }
 0x182   :  { %v244_v19 = vadd.f32 %v243_v17, %v242_v16 }
 0x184   :  { %v245_v20 = vrot.slane %v244_v19, 2 }
 0x186   :  { %v246_v21 = vadd.f32 %v245_v20, %v244_v19 }
 0x188   :  { %v247_v22 = vrot.slane %v246_v21, 1 }
 0x18a   :  { %v248_v23 = vadd.f32 %v247_v22, %v246_v21 }
 0x18c   :  { %267 = vpush %v248_v23 }
 0x1bd   :  { %s268_s0 = spop %267 }
 0x1be   :  { %251 = sst [smem:[#allocation10]] %s268_s0 }
 0x1bf   :  { %259 = dma.smem_to_hbm %s370_s1, 16, %s493_s2, [#allocation7]  }
 0x1c0   :  { %363 = dma.done.wait [#allocation7], 16  }
 0x1c1   :  { %364 = vsyncadd [#allocation7], 4294967280 }
 0x1c2   :  { %263 = sfence }
 0x1c3   :  { %264 = vsyncpa [#allocation6], 1 }
 0x1c4   :  { %265 = vsyncpa [#allocation9], 1 }
 0x1c5   :  { %266 = vsyncpa [#allocation7], 1 }

</bundles_post_ra>
